<compile_context>
chip_gen: v5e
topology: v5e:2x2
jax: 0.10.0
libtpu: 0.0.40
codegen_flags: <defaults>
</compile_context>

<pallas_src>
import functools

import jax
import jax.numpy as jnp
from jax.experimental import pallas as pl
from jax.experimental.pallas import tpu as pltpu


def _single_block_kernel(x_ref, o_ref):
    # Small-N fallback: whole problem in one block (call overhead dominates).
    n = x_ref.shape[0]
    x = x_ref[...]
    o_ref[pl.ds(0, n), :] = jnp.transpose(x)
    o_ref[pl.ds(n, n), :] = x


def _tiled_kernel(x_ref, o_ref, tbuf, tsem, csem, *, tile, n, nb):
    i = pl.program_id(0)   # input block-row   ("parallel" axis)
    j = pl.program_id(1)   # input block-col   (sequential on each core)
    slot = j % 2           # double-buffer slot for the transposed tile

    # ---- 1) Copy-out: the raw input block goes straight to the bottom half.
    bot_r = pl.multiple_of(n + i * tile, tile)
    bot_c = pl.multiple_of(j * tile, tile)
    copy_out = pltpu.make_async_copy(
        x_ref,
        o_ref.at[pl.ds(bot_r, tile), pl.ds(bot_c, tile)],
        csem.at[0],
    )
    copy_out.start()

    # Helper: retire the transpose DMA previously issued from tbuf[s].
    # (Wait only needs a same-shaped descriptor + the semaphore.)
    def _wait_tslot(s):
        pltpu.make_async_copy(
            tbuf.at[s],
            o_ref.at[pl.ds(0, tile), pl.ds(0, tile)],
            tsem.at[s],
        ).wait()

    # ---- 2) Make sure tbuf[slot] is free (its DMA was issued 2 steps ago).
    @pl.when(j >= 2)
    def _():
        _wait_tslot(slot)

    # ---- 3) Transpose the input block into tbuf[slot] (128x128 XLU sub-tiles).
    sub = 128
    nt = tile // sub
    for a in range(nt):
        for b in range(nt):
            tbuf[slot, a * sub:(a + 1) * sub, b * sub:(b + 1) * sub] = jnp.transpose(
                x_ref[b * sub:(b + 1) * sub, a * sub:(a + 1) * sub]
            )

    # ---- 4) Transposed tile -> top half of the output (block (j, i)).
    top_r = pl.multiple_of(j * tile, tile)
    top_c = pl.multiple_of(i * tile, tile)
    pltpu.make_async_copy(
        tbuf.at[slot],
        o_ref.at[pl.ds(top_r, tile), pl.ds(top_c, tile)],
        tsem.at[slot],
    ).start()

    # ---- 5) Copy-out must complete before the step ends (the pipelined input
    #         buffer is recycled for the prefetch of step j+2).
    copy_out.wait()

    # ---- 6) End-of-row drain: retire all transpose DMAs still in flight.
    @pl.when(j == nb - 1)
    def _():
        if nb >= 2:            # static (Python) branch
            _wait_tslot(1 - slot)
        _wait_tslot(slot)


def model_forward(x0: jax.Array) -> jax.Array:
    n, m = x0.shape
    assert n == m, "forward only valid for square 2D inputs (torch.cat dim-0 needs matching dim 1)"
    itemsize = jnp.dtype(x0.dtype).itemsize
    # Minimum HBM traffic: read x once (N^2) + write the (2N, N) output (2 N^2).
    bytes_accessed = 3 * n * n * itemsize

    tile = 0
    if n % 128 == 0:
        for t in (512, 384, 256, 128):     # largest lane-dense divisor of N
            if n % t == 0:
                tile = t
                break

    if tile:
        nb = n // tile
        kernel = functools.partial(_tiled_kernel, tile=tile, n=n, nb=nb)
        return pl.pallas_call(
            kernel,
            out_shape=jax.ShapeDtypeStruct((2 * n, n), x0.dtype),
            grid=(nb, nb),
            in_specs=[pl.BlockSpec((tile, tile), lambda i, j: (i, j))],
            out_specs=pl.BlockSpec(memory_space=pl.ANY),
            scratch_shapes=[
                pltpu.VMEM((2, tile, tile), x0.dtype),   # double-buffered transposed tile
                pltpu.SemaphoreType.DMA((2,)),           # transpose write-out sems
                pltpu.SemaphoreType.DMA((1,)),           # copy-out sem
            ],
            compiler_params=pltpu.CompilerParams(
                dimension_semantics=("parallel", "arbitrary")),
            cost_estimate=pl.CostEstimate(
                flops=0, transcendentals=0, bytes_accessed=bytes_accessed),
        )(x0)

    if n <= 512:
        # Small ragged N: single-block path (near the call-overhead floor).
        return pl.pallas_call(
            _single_block_kernel,
            out_shape=jax.ShapeDtypeStruct((2 * n, n), x0.dtype),
            grid=(1,),
            in_specs=[pl.BlockSpec((n, n), lambda i: (0, 0))],
            out_specs=pl.BlockSpec((2 * n, n), lambda i: (0, 0)),
            compiler_params=pltpu.CompilerParams(
                dimension_semantics=("arbitrary",)),
            cost_estimate=pl.CostEstimate(
                flops=0, transcendentals=0, bytes_accessed=bytes_accessed),
        )(x0)

    # TODO(synk): large N not divisible by 128 needs masked edge tiles in the
    # tiled path; fall back to XLA here rather than staging (N,N)+(2N,N) in VMEM.
    return jnp.concatenate([jnp.transpose(x0), x0], axis=0)


if __name__ == "__main__":
    key = jax.random.PRNGKey(0)
    # Shapes chosen to exercise: tile==N single-step (128, 512), multi-step
    # pipelining + deferred waits + drain (640 -> tile 128, nb 5), and the
    # 384-tile divisor with the nb==2 drain edge case (768).
    for idx, n in enumerate((128, 512, 640, 768)):
        x = jax.random.normal(jax.random.fold_in(key, idx), (n, n), dtype=jnp.float32)
        out = jax.block_until_ready(model_forward(x))
        ref = jnp.concatenate([jnp.transpose(x), x], axis=0)
        assert out.shape == (2 * n, n)
        assert jnp.allclose(out, ref), f"mismatch vs reference for n={n}"
    print("KERNEL_OK")
</pallas_src>

<mosaic_0001>
module attributes {stable_mosaic.version = 11 : i64} {
  func.func @_tiled_kernel(%arg0: i32, %arg1: i32, %arg2: memref<128x128xf32, #tpu.memory_space<vmem>>, %arg3: memref<256x128xf32, #tpu.memory_space<any>>, %arg4: memref<2x128x128xf32, #tpu.memory_space<vmem>>, %arg5: memref<2x!tpu.dma_semaphore, #tpu.memory_space<semaphore_mem>>, %arg6: memref<1x!tpu.dma_semaphore, #tpu.memory_space<semaphore_mem>>) attributes {dimension_semantics = [#tpu.dimension_semantics<parallel>, #tpu.dimension_semantics<arbitrary>], iteration_bounds = array<i64: 1, 1>, scalar_prefetch = 0 : i64, scratch_operands = 3 : i64, tpu.core_type = #tpu.core_type<tc>, window_params = [{transform_indices = @transform_0, window_bounds = array<i64: 128, 128>}, {}]} {
    %c2_i32 = arith.constant 2 : i32
    %c0_i32 = arith.constant 0 : i32
    %0 = arith.cmpi eq, %c2_i32, %c0_i32 : i32
    %c1_i32 = arith.constant 1 : i32
    %1 = arith.select %0, %c1_i32, %c2_i32 : i32
    %2 = arith.remsi %arg1, %1 : i32
    %c0_i32_0 = arith.constant 0 : i32
    %3 = arith.cmpi ne, %2, %c0_i32_0 : i32
    %c0_i32_1 = arith.constant 0 : i32
    %4 = arith.cmpi slt, %2, %c0_i32_1 : i32
    %c0_i32_2 = arith.constant 0 : i32
    %5 = arith.cmpi slt, %1, %c0_i32_2 : i32
    %6 = arith.xori %4, %5 : i1
    %7 = arith.andi %6, %3 : i1
    %8 = arith.addi %2, %1 : i32
    %9 = arith.select %7, %8, %2 : i32
    %c128_i32 = arith.constant 128 : i32
    %10 = arith.muli %arg0, %c128_i32 : i32
    %c128_i32_3 = arith.constant 128 : i32
    %11 = arith.addi %c128_i32_3, %10 : i32
    %12 = tpu.assume_multiple %11, 128 : i32
    %c128_i32_4 = arith.constant 128 : i32
    %13 = arith.muli %arg1, %c128_i32_4 : i32
    %14 = tpu.assume_multiple %13, 128 : i32
    %c0_i32_5 = arith.constant 0 : i32
    %15 = tpu.memref_slice %arg3[%12, %14] : memref<256x128xf32, #tpu.memory_space<any>> -> memref<128x128xf32, #tpu.memory_space<any>>
    %16 = tpu.memref_slice %arg6[%c0_i32_5] : memref<1x!tpu.dma_semaphore, #tpu.memory_space<semaphore_mem>> -> memref<1x!tpu.dma_semaphore, #tpu.memory_space<semaphore_mem>>
    %17 = tpu.memref_squeeze %16 : memref<1x!tpu.dma_semaphore, #tpu.memory_space<semaphore_mem>> -> memref<!tpu.dma_semaphore, #tpu.memory_space<semaphore_mem>>
    tpu.enqueue_dma source(%arg2 : memref<128x128xf32, #tpu.memory_space<vmem>>) target(%15 : memref<128x128xf32, #tpu.memory_space<any>>) target_semaphore(%17 : memref<!tpu.dma_semaphore, #tpu.memory_space<semaphore_mem>>)
    %c2_i32_6 = arith.constant 2 : i32
    %18 = arith.cmpi sge, %arg1, %c2_i32_6 : i32
    %19 = arith.extui %18 : i1 to i32
    %c0_i32_7 = arith.constant 0 : i32
    %20 = arith.cmpi ne, %19, %c0_i32_7 : i32
    scf.if %20 {
      %c0_i32_18 = arith.constant 0 : i32
      %c0_i32_19 = arith.constant 0 : i32
      %42 = tpu.memref_slice %arg4[%9, %c0_i32_18, %c0_i32_19] : memref<2x128x128xf32, #tpu.memory_space<vmem>> -> memref<1x128x128xf32, #tpu.memory_space<vmem>>
      %43 = tpu.memref_squeeze %42 : memref<1x128x128xf32, #tpu.memory_space<vmem>> -> memref<128x128xf32, #tpu.memory_space<vmem>>
      %c0_i32_20 = arith.constant 0 : i32
      %c0_i32_21 = arith.constant 0 : i32
      %44 = tpu.memref_slice %arg3[%c0_i32_20, %c0_i32_21] : memref<256x128xf32, #tpu.memory_space<any>> -> memref<128x128xf32, #tpu.memory_space<any>>
      %45 = tpu.memref_slice %arg5[%9] : memref<2x!tpu.dma_semaphore, #tpu.memory_space<semaphore_mem>> -> memref<1x!tpu.dma_semaphore, #tpu.memory_space<semaphore_mem>>
      %46 = tpu.memref_squeeze %45 : memref<1x!tpu.dma_semaphore, #tpu.memory_space<semaphore_mem>> -> memref<!tpu.dma_semaphore, #tpu.memory_space<semaphore_mem>>
      tpu.wait_dma2 semaphore(%46 : memref<!tpu.dma_semaphore, #tpu.memory_space<semaphore_mem>>) src(%43 : memref<128x128xf32, #tpu.memory_space<vmem>>) dst(%44 : memref<128x128xf32, #tpu.memory_space<any>>)
    } else {
    }
    %c0 = arith.constant 0 : index
    %c0_8 = arith.constant 0 : index
    %21 = vector.load %arg2[%c0, %c0_8] : memref<128x128xf32, #tpu.memory_space<vmem>>, vector<128x128xf32>
    %22 = tpu.transpose %21, [1, 0] : vector<128x128xf32> -> vector<128x128xf32>
    %23 = arith.index_cast %9 : i32 to index
    %c0_9 = arith.constant 0 : index
    %c0_10 = arith.constant 0 : index
    %24 = vector.load %arg4[%23, %c0_9, %c0_10] : memref<2x128x128xf32, #tpu.memory_space<vmem>>, vector<1x128x128xf32>
    %25 = vector.shape_cast %24 : vector<1x128x128xf32> to vector<128x128xf32>
    %26 = vector.shape_cast %22 : vector<128x128xf32> to vector<1x128x128xf32>
    tpu.vector_store %arg4[%23, %c0_9, %c0_10], %26 {strides = array<i32>} : memref<2x128x128xf32, #tpu.memory_space<vmem>>, vector<1x128x128xf32>,
    %c128_i32_11 = arith.constant 128 : i32
    %27 = arith.muli %arg1, %c128_i32_11 : i32
    %28 = tpu.assume_multiple %27, 128 : i32
    %c128_i32_12 = arith.constant 128 : i32
    %29 = arith.muli %arg0, %c128_i32_12 : i32
    %30 = tpu.assume_multiple %29, 128 : i32
    %c0_i32_13 = arith.constant 0 : i32
    %c0_i32_14 = arith.constant 0 : i32
    %31 = tpu.memref_slice %arg4[%9, %c0_i32_13, %c0_i32_14] : memref<2x128x128xf32, #tpu.memory_space<vmem>> -> memref<1x128x128xf32, #tpu.memory_space<vmem>>
    %32 = tpu.memref_squeeze %31 : memref<1x128x128xf32, #tpu.memory_space<vmem>> -> memref<128x128xf32, #tpu.memory_space<vmem>>
    %33 = tpu.memref_slice %arg3[%28, %30] : memref<256x128xf32, #tpu.memory_space<any>> -> memref<128x128xf32, #tpu.memory_space<any>>
    %34 = tpu.memref_slice %arg5[%9] : memref<2x!tpu.dma_semaphore, #tpu.memory_space<semaphore_mem>> -> memref<1x!tpu.dma_semaphore, #tpu.memory_space<semaphore_mem>>
    %35 = tpu.memref_squeeze %34 : memref<1x!tpu.dma_semaphore, #tpu.memory_space<semaphore_mem>> -> memref<!tpu.dma_semaphore, #tpu.memory_space<semaphore_mem>>
    tpu.enqueue_dma source(%32 : memref<128x128xf32, #tpu.memory_space<vmem>>) target(%33 : memref<128x128xf32, #tpu.memory_space<any>>) target_semaphore(%35 : memref<!tpu.dma_semaphore, #tpu.memory_space<semaphore_mem>>)
    %c0_i32_15 = arith.constant 0 : i32
    %36 = tpu.memref_slice %arg3[%12, %14] : memref<256x128xf32, #tpu.memory_space<any>> -> memref<128x128xf32, #tpu.memory_space<any>>
    %37 = tpu.memref_slice %arg6[%c0_i32_15] : memref<1x!tpu.dma_semaphore, #tpu.memory_space<semaphore_mem>> -> memref<1x!tpu.dma_semaphore, #tpu.memory_space<semaphore_mem>>
    %38 = tpu.memref_squeeze %37 : memref<1x!tpu.dma_semaphore, #tpu.memory_space<semaphore_mem>> -> memref<!tpu.dma_semaphore, #tpu.memory_space<semaphore_mem>>
    tpu.wait_dma2 semaphore(%38 : memref<!tpu.dma_semaphore, #tpu.memory_space<semaphore_mem>>) src(%arg2 : memref<128x128xf32, #tpu.memory_space<vmem>>) dst(%36 : memref<128x128xf32, #tpu.memory_space<any>>)
    %c0_i32_16 = arith.constant 0 : i32
    %39 = arith.cmpi eq, %arg1, %c0_i32_16 : i32
    %40 = arith.extui %39 : i1 to i32
    %c0_i32_17 = arith.constant 0 : i32
    %41 = arith.cmpi ne, %40, %c0_i32_17 : i32
    scf.if %41 {
      %c0_i32_18 = arith.constant 0 : i32
      %c0_i32_19 = arith.constant 0 : i32
      %42 = tpu.memref_slice %arg4[%9, %c0_i32_18, %c0_i32_19] : memref<2x128x128xf32, #tpu.memory_space<vmem>> -> memref<1x128x128xf32, #tpu.memory_space<vmem>>
      %43 = tpu.memref_squeeze %42 : memref<1x128x128xf32, #tpu.memory_space<vmem>> -> memref<128x128xf32, #tpu.memory_space<vmem>>
      %c0_i32_20 = arith.constant 0 : i32
      %c0_i32_21 = arith.constant 0 : i32
      %44 = tpu.memref_slice %arg3[%c0_i32_20, %c0_i32_21] : memref<256x128xf32, #tpu.memory_space<any>> -> memref<128x128xf32, #tpu.memory_space<any>>
      %45 = tpu.memref_slice %arg5[%9] : memref<2x!tpu.dma_semaphore, #tpu.memory_space<semaphore_mem>> -> memref<1x!tpu.dma_semaphore, #tpu.memory_space<semaphore_mem>>
      %46 = tpu.memref_squeeze %45 : memref<1x!tpu.dma_semaphore, #tpu.memory_space<semaphore_mem>> -> memref<!tpu.dma_semaphore, #tpu.memory_space<semaphore_mem>>
      tpu.wait_dma2 semaphore(%46 : memref<!tpu.dma_semaphore, #tpu.memory_space<semaphore_mem>>) src(%43 : memref<128x128xf32, #tpu.memory_space<vmem>>) dst(%44 : memref<128x128xf32, #tpu.memory_space<any>>)
    } else {
    }
    return
  }
  func.func @transform_0(%arg0: i32, %arg1: i32) -> (i32, i32) {
    %c0_i32 = arith.constant 0 : i32
    return %arg0, %arg1 : i32, i32
  }
}

</mosaic_0001>

<bundles_post_ra>
// kernel: tpu_custom_call.1
= control target key start
LH: loop header
LB: loop body
LE: loop exit
PB: predicated region body
PF: predicated region fallthrough
CT: control target
= control target key end

     0   :  { %6 = vsyncpa [#allocation6], 0  ;;  %s265_s9 = smov [#allocation5]   ;;  %s266_s11 = smov 128   ;;  %s295_s0 = inlined_call_operand.hbm [shape: f32[128,128], index: 0, kind: input, shape index: {}]   ;;  %s296_s1 = inlined_call_operand.hbm [shape: f32[256,128], index: 1, kind: output, shape index: {}]  }
   0x1   :  { %s11_s8 = sshll.u32 %s295_s0, 4  ;;  %s282_s10 = sshll.u32 %s265_s9, 4  ;;  %s12_s8 = int_to_ptr.hbm [resolvable:$true] %s11_s8  ;;  %s14_s10 = int_to_ptr.vmem [resolvable:$true] %s282_s10 }
   0x2   :  { %s267_s12 = smov 8  }
   0x3   :  { %19 = dma.hbm_to_vmem [thread:$0]  %s12_s8, 2048, %s14_s10, [#allocation6], %s266_s11, %s266_s11, %s267_s12  }
   0x4   :  { %259 = dma.done.wait [#allocation6], 2048  }
   0x5   :  { %260 = vsyncadd [#allocation6], 4294965248  ;;  %v60_v0 = vld [vmem:[#allocation5] sm:$0xff]  ;;  %v61_v1 = vld [vmem:[#allocation5 + $0x8] sm:$0xff]  ;;  %s174_s14 = scalar_lea.hbm %s296_s1, 128  ;;  %s268_s16 = smov [#allocation2]  }
   0x6   :  { %76 = vxpose.xlu0.b32.start [1/16] %v60_v0, 128  ;;  %v62_v2 = vld [vmem:[#allocation5 + $0x10] sm:$0xff]  ;;  %v63_v3 = vld [vmem:[#allocation5 + $0x18] sm:$0xff]  ;;  %v64_v4 = vld [vmem:[#allocation5 + $0x20] sm:$0xff]  ;;  %s48_s15 = sshll.u32 %s174_s14, 4  ;;  %s138_s17 = sshll.u32 %s268_s16, 4  ;;  %s49_s15 = int_to_ptr.hbm [resolvable:$true] %s48_s15  ;;  %s139_s17 = int_to_ptr.vmem [resolvable:$true] %s138_s17 }
   0x7   :  { %v65_v5 = vld [vmem:[#allocation5 + $0x28] sm:$0xff]  ;;  %v66_v6 = vld [vmem:[#allocation5 + $0x30] sm:$0xff]  ;;  %v67_v7 = vld [vmem:[#allocation5 + $0x38] sm:$0xff]  ;;  %51 = dma.vmem_to_hbm [thread:$0]  %s14_s10, 2048, %s49_s15, [#allocation4] }
   0x8   :  { %v68_v8 = vld [vmem:[#allocation5 + $0x40] sm:$0xff]  ;;  %v69_v9 = vld [vmem:[#allocation5 + $0x48] sm:$0xff]  ;;  %v70_v10 = vld [vmem:[#allocation5 + $0x50] sm:$0xff]  ;;  %s140_s20 = sshll.u32 %s296_s1, 4  ;;  %s141_s20 = int_to_ptr.hbm [resolvable:$true] %s140_s20 }
   0x9   :  { %v71_v11 = vld [vmem:[#allocation5 + $0x58] sm:$0xff]  ;;  %v72_v12 = vld [vmem:[#allocation5 + $0x60] sm:$0xff]  ;;  %v73_v13 = vld [vmem:[#allocation5 + $0x68] sm:$0xff] }
   0xa   :  { %v74_v14 = vld [vmem:[#allocation5 + $0x70] sm:$0xff]  ;;  %v75_v15 = vld [vmem:[#allocation5 + $0x78] sm:$0xff] }
   0xe   :  { %77 = vxpose.xlu0.b32.cont [2/16] %v61_v1, 128 }
  0x16   :  { %78 = vxpose.xlu0.b32.cont [3/16] %v62_v2, 128 }
  0x1e   :  { %79 = vxpose.xlu0.b32.cont [4/16] %v63_v3, 128 }
  0x26   :  { %80 = vxpose.xlu0.b32.cont [5/16] %v64_v4, 128 }
  0x2e   :  { %81 = vxpose.xlu0.b32.cont [6/16] %v65_v5, 128 }
  0x36   :  { %82 = vxpose.xlu0.b32.cont [7/16] %v66_v6, 128 }
  0x3e   :  { %83 = vxpose.xlu0.b32.cont [8/16] %v67_v7, 128 }
  0x46   :  { %84 = vxpose.xlu0.b32.cont [9/16] %v68_v8, 128 }
  0x4e   :  { %85 = vxpose.xlu0.b32.cont [10/16] %v69_v9, 128 }
  0x56   :  { %86 = vxpose.xlu0.b32.cont [11/16] %v70_v10, 128 }
  0x5e   :  { %87 = vxpose.xlu0.b32.cont [12/16] %v71_v11, 128 }
  0x66   :  { %88 = vxpose.xlu0.b32.cont [13/16] %v72_v12, 128 }
  0x6e   :  { %89 = vxpose.xlu0.b32.cont [14/16] %v73_v13, 128 }
  0x76   :  { %90 = vxpose.xlu0.b32.cont [15/16] %v74_v14, 128 }
  0x7e   :  { %91 = vxpose.xlu0.b32.end [16/16] %v75_v15, 128 }
  0xaa   :  { %v92_v16 = vpop.trf.xlu0 }
  0xab   :  { %110 = vst [vmem:[#allocation2] sm:$0xff] %v92_v16 }
  0xb2   :  { %v93_v17 = vpop.trf.xlu0 }
  0xb3   :  { %111 = vst [vmem:[#allocation2 + $0x8] sm:$0xff] %v93_v17 }
  0xba   :  { %v94_v18 = vpop.trf.xlu0 }
  0xbb   :  { %112 = vst [vmem:[#allocation2 + $0x10] sm:$0xff] %v94_v18 }
  0xc2   :  { %v95_v19 = vpop.trf.xlu0 }
  0xc3   :  { %113 = vst [vmem:[#allocation2 + $0x18] sm:$0xff] %v95_v19 }
  0xca   :  { %v96_v20 = vpop.trf.xlu0 }
  0xcb   :  { %114 = vst [vmem:[#allocation2 + $0x20] sm:$0xff] %v96_v20 }
  0xd2   :  { %v97_v21 = vpop.trf.xlu0 }
  0xd3   :  { %115 = vst [vmem:[#allocation2 + $0x28] sm:$0xff] %v97_v21 }
  0xda   :  { %v98_v22 = vpop.trf.xlu0 }
  0xdb   :  { %116 = vst [vmem:[#allocation2 + $0x30] sm:$0xff] %v98_v22 }
  0xe2   :  { %v99_v23 = vpop.trf.xlu0 }
  0xe3   :  { %117 = vst [vmem:[#allocation2 + $0x38] sm:$0xff] %v99_v23 }
  0xea   :  { %v100_v24 = vpop.trf.xlu0 }
  0xeb   :  { %118 = vst [vmem:[#allocation2 + $0x40] sm:$0xff] %v100_v24 }
  0xf2   :  { %v101_v25 = vpop.trf.xlu0 }
  0xf3   :  { %119 = vst [vmem:[#allocation2 + $0x48] sm:$0xff] %v101_v25 }
  0xfa   :  { %v102_v26 = vpop.trf.xlu0 }
  0xfb   :  { %120 = vst [vmem:[#allocation2 + $0x50] sm:$0xff] %v102_v26 }
 0x102   :  { %v103_v27 = vpop.trf.xlu0 }
 0x103   :  { %121 = vst [vmem:[#allocation2 + $0x58] sm:$0xff] %v103_v27 }
 0x10a   :  { %v104_v28 = vpop.trf.xlu0 }
 0x10b   :  { %122 = vst [vmem:[#allocation2 + $0x60] sm:$0xff] %v104_v28 }
 0x112   :  { %v105_v29 = vpop.trf.xlu0 }
 0x113   :  { %123 = vst [vmem:[#allocation2 + $0x68] sm:$0xff] %v105_v29 }
 0x11a   :  { %v106_v30 = vpop.trf.xlu0 }
 0x11b   :  { %124 = vst [vmem:[#allocation2 + $0x70] sm:$0xff] %v106_v30 }
 0x122   :  { %v107_v31 = vpop.trf.xlu0 }
 0x123   :  { %125 = vst [vmem:[#allocation2 + $0x78] sm:$0xff] %v107_v31 }
 0x124   :  { %143 = dma.vmem_to_hbm [thread:$0]  %s139_s17, 2048, %s141_s20, [#allocation3] }
 0x125   :  { %261 = dma.done.wait [#allocation4], 2048 }
 0x126   :  { %262 = vsyncadd [#allocation4], 4294965248 }
 0x127   :  { %263 = dma.done.wait [#allocation3], 2048 }
 0x128   :  { %264 = vsyncadd [#allocation3], 4294965248 }
 0x129   :  { %153 = vsyncpa [#allocation6], 1 }
 0x12a   :  { %154 = vsyncmov [#allocation3] }
 0x12d   :  { %s155_s21 = vpop.sfrf %154 }
 0x12e   :  { %p180_p0 = scmp.ne.s32.totalorder %s155_s21, 0 }
 0x130   :  { %159 = shalt.err (%p180_p0)  }
 0x131   :  { %161 = vsyncmov [#allocation3 + $0x1] }
 0x134   :  { %s162_s22 = vpop.sfrf %161 }
 0x135   :  { %p181_p1 = scmp.ne.s32.totalorder %s162_s22, 0 }
 0x137   :  { %166 = shalt.err (%p181_p1)  }
 0x138   :  { %167 = vsyncmov [#allocation4] }
 0x13b   :  { %s168_s1 = vpop.sfrf %167 }
 0x13c   :  { %p182_p2 = scmp.ne.s32.totalorder %s168_s1, 0 }
 0x13e   :  { %172 = shalt.err (%p182_p2)  }

</bundles_post_ra>
